<compile_context>
chip_gen: v5e
topology: v5e:2x2
jax: 0.10.0
libtpu: 0.0.40
codegen_flags: <defaults>
</compile_context>

<pallas_src>
import jax
import jax.numpy as jnp
from jax.experimental import pallas as pl
from jax.experimental.pallas import tpu as pltpu


def _leaky_relu(x, slope=0.01):           # torch nn.LeakyReLU default slope
    return jnp.where(x >= 0, x, slope * x)


def _query1d_kernel(theta_ref, code_ref,
                    amp1_w_ref, amp1_b_ref, amp2_w_ref, amp2_b_ref,
                    mlp1_wa_ref, mlp1_wc_ref, mlp1_b_ref,
                    mlp2_w_ref, mlp2_b_ref,
                    mlp3_w_ref, mlp3_b_ref,
                    mlp4_w_ref, mlp4_b_ref,
                    out_ref):
    # theta_ref: (Bt, T, t_dim)   code_ref: (Bt, 1, c_dim)   out_ref: (Bt, T, ci_dim)
    Bt, T, t_dim = theta_ref.shape
    hidden = mlp2_w_ref.shape[0]
    c_dim = code_ref.shape[2]

    theta = theta_ref[...].reshape(Bt * T, t_dim)          # (R, t_dim), R = Bt*T
    code = code_ref[...].reshape(Bt, c_dim)                # (Bt, c_dim)

    # ---- amp = Linear -> LeakyReLU -> Linear (on theta rows) ----
    h = jnp.dot(theta, amp1_w_ref[...],
                preferred_element_type=jnp.float32) + amp1_b_ref[...]
    h = _leaky_relu(h)
    amp = jnp.dot(h, amp2_w_ref[...],
                  preferred_element_type=jnp.float32) + amp2_b_ref[...]   # (R, amp_dim)

    # ---- first MLP layer: concat([amp, code]) folded into split matmuls ----
    # torch: Linear(amp_dim + c_dim, hidden) applied to cat([amp, code], -1)
    h_amp = jnp.dot(amp, mlp1_wa_ref[...],
                    preferred_element_type=jnp.float32)                    # (R, hidden)
    h_code = jnp.dot(code, mlp1_wc_ref[...],
                     preferred_element_type=jnp.float32)                   # (Bt, hidden)
    h = h_amp.reshape(Bt, T, hidden) + h_code[:, None, :] + mlp1_b_ref[...]
    h = _leaky_relu(h.reshape(Bt * T, hidden))

    # ---- remaining MLP layers ----
    h = _leaky_relu(jnp.dot(h, mlp2_w_ref[...],
                            preferred_element_type=jnp.float32) + mlp2_b_ref[...])
    h = _leaky_relu(jnp.dot(h, mlp3_w_ref[...],
                            preferred_element_type=jnp.float32) + mlp3_b_ref[...])
    ci = jnp.dot(h, mlp4_w_ref[...],
                 preferred_element_type=jnp.float32) + mlp4_b_ref[...]     # (R, ci_dim)

    out_ref[...] = ci.reshape(Bt, T, -1)


def _full_spec(arr):
    nd = arr.ndim
    return pl.BlockSpec(arr.shape, lambda b, _nd=nd: (0,) * _nd)


def query1d_larger_pallas(code, theta, prm, *, block_b=None):
    """code: (B, c_dim), theta: (B, T, t_dim) -> ci: (B, T, ci_dim)."""
    B, T, t_dim = theta.shape
    c_dim = code.shape[1]
    ci_dim = prm["mlp4_w"].shape[1]

    if block_b is None:
        # >= 2 grid steps when possible (v7x: 2 TensorCores) while still
        # folding block_b * T rows into each matmul.
        block_b = B // 2 if (B % 2 == 0 and B >= 2) else B
    assert B % block_b == 0, (B, block_b)
    grid = (B // block_b,)

    code3 = code.reshape(B, 1, c_dim)   # so the code block keeps full last-2 dims

    weight_args = [prm["amp1_w"], prm["amp1_b"], prm["amp2_w"], prm["amp2_b"],
                   prm["mlp1_wa"], prm["mlp1_wc"], prm["mlp1_b"],
                   prm["mlp2_w"], prm["mlp2_b"],
                   prm["mlp3_w"], prm["mlp3_b"],
                   prm["mlp4_w"], prm["mlp4_b"]]

    return pl.pallas_call(
        _query1d_kernel,
        out_shape=jax.ShapeDtypeStruct((B, T, ci_dim), jnp.float32),
        grid=grid,
        in_specs=[pl.BlockSpec((block_b, T, t_dim), lambda b: (b, 0, 0)),
                  pl.BlockSpec((block_b, 1, c_dim), lambda b: (b, 0, 0))]
                 + [_full_spec(a) for a in weight_args],
        out_specs=pl.BlockSpec((block_b, T, ci_dim), lambda b: (b, 0, 0)),
        compiler_params=pltpu.CompilerParams(
            dimension_semantics=("parallel",)),
    )(theta, code3, *weight_args)


def init_query1d_larger(key, ci_dim, c_dim, t_dim, amp_dim, hidden_dim):
    # Deterministic synthetic init, shapes follow the torch __init__ (weights
    # stored as (in, out)); the first MLP weight is kept pre-split into its
    # amp / code halves (exactly equivalent to Linear(c_dim + amp_dim, hidden)).
    ks = jax.random.split(key, 13)
    s = 0.1
    f32 = jnp.float32
    return {
        "amp1_w": jax.random.normal(ks[0], (t_dim, amp_dim // 2), f32) * s,
        "amp1_b": jax.random.normal(ks[1], (1, amp_dim // 2), f32) * s,
        "amp2_w": jax.random.normal(ks[2], (amp_dim // 2, amp_dim), f32) * s,
        "amp2_b": jax.random.normal(ks[3], (1, amp_dim), f32) * s,
        "mlp1_wa": jax.random.normal(ks[4], (amp_dim, hidden_dim), f32) * s,
        "mlp1_wc": jax.random.normal(ks[5], (c_dim, hidden_dim), f32) * s,
        "mlp1_b": jax.random.normal(ks[6], (1, hidden_dim), f32) * s,
        "mlp2_w": jax.random.normal(ks[7], (hidden_dim, hidden_dim), f32) * s,
        "mlp2_b": jax.random.normal(ks[8], (1, hidden_dim), f32) * s,
        "mlp3_w": jax.random.normal(ks[9], (hidden_dim, hidden_dim), f32) * s,
        "mlp3_b": jax.random.normal(ks[10], (1, hidden_dim), f32) * s,
        "mlp4_w": jax.random.normal(ks[11], (hidden_dim, ci_dim), f32) * s,
        "mlp4_b": jax.random.normal(ks[12], (1, ci_dim), f32) * s,
    }


# ------------------------- pure-JAX reference (torch-faithful) ---------------
def _query1d_ref(code, theta, prm):
    B, T, _ = theta.shape
    h = _leaky_relu(theta @ prm["amp1_w"] + prm["amp1_b"])
    amp = h @ prm["amp2_w"] + prm["amp2_b"]
    code_e = jnp.broadcast_to(code[:, None, :], (B, T, code.shape[-1]))
    f = jnp.concatenate([amp, code_e], axis=-1)                 # torch.cat([amp, code], -1)
    w1 = jnp.concatenate([prm["mlp1_wa"], prm["mlp1_wc"]], axis=0)
    h = _leaky_relu(f @ w1 + prm["mlp1_b"])
    h = _leaky_relu(h @ prm["mlp2_w"] + prm["mlp2_b"])
    h = _leaky_relu(h @ prm["mlp3_w"] + prm["mlp3_b"])
    return h @ prm["mlp4_w"] + prm["mlp4_b"]


if __name__ == "__main__":
    # Small shapes consistent with the module's forward.
    B, T = 2, 8
    t_dim, amp_dim, c_dim, hidden_dim, ci_dim = 8, 32, 32, 64, 32

    key = jax.random.PRNGKey(0)
    k_code, k_theta, k_prm = jax.random.split(key, 3)

    code = jax.random.normal(k_code, (B, c_dim), jnp.float32)
    theta = jax.random.normal(k_theta, (B, T, t_dim), jnp.float32)
    prm = init_query1d_larger(k_prm, ci_dim=ci_dim, c_dim=c_dim, t_dim=t_dim,
                              amp_dim=amp_dim, hidden_dim=hidden_dim)

    ci = query1d_larger_pallas(code, theta, prm)
    ci = jax.block_until_ready(ci)

    ci_ref = _query1d_ref(code, theta, prm)
    assert ci.shape == (B, T, ci_dim), ci.shape
    assert jnp.allclose(ci, ci_ref, rtol=1e-4, atol=1e-4), \
        float(jnp.max(jnp.abs(ci - ci_ref)))

    print("KERNEL_OK")
</pallas_src>

<mosaic_0001>
module attributes {stable_mosaic.version = 11 : i64} {
  func.func @_query1d_kernel(%arg0: i32, %arg1: memref<1x8x8xf32, #tpu.memory_space<vmem>>, %arg2: memref<1x1x32xf32, #tpu.memory_space<vmem>>, %arg3: memref<8x16xf32, #tpu.memory_space<vmem>>, %arg4: memref<1x16xf32, #tpu.memory_space<vmem>>, %arg5: memref<16x32xf32, #tpu.memory_space<vmem>>, %arg6: memref<1x32xf32, #tpu.memory_space<vmem>>, %arg7: memref<32x64xf32, #tpu.memory_space<vmem>>, %arg8: memref<32x64xf32, #tpu.memory_space<vmem>>, %arg9: memref<1x64xf32, #tpu.memory_space<vmem>>, %arg10: memref<64x64xf32, #tpu.memory_space<vmem>>, %arg11: memref<1x64xf32, #tpu.memory_space<vmem>>, %arg12: memref<64x64xf32, #tpu.memory_space<vmem>>, %arg13: memref<1x64xf32, #tpu.memory_space<vmem>>, %arg14: memref<64x32xf32, #tpu.memory_space<vmem>>, %arg15: memref<1x32xf32, #tpu.memory_space<vmem>>, %arg16: memref<1x8x32xf32, #tpu.memory_space<vmem>>) attributes {dimension_semantics = [#tpu.dimension_semantics<parallel>], iteration_bounds = array<i64: 2>, scalar_prefetch = 0 : i64, scratch_operands = 0 : i64, tpu.core_type = #tpu.core_type<tc>, window_params = [{transform_indices = @transform_0, window_bounds = array<i64: 1, 8, 8>}, {transform_indices = @transform_1, window_bounds = array<i64: 1, 1, 32>}, {pipeline_mode = #tpu.pipeline_mode<synchronous>, transform_indices = @transform_2, window_bounds = array<i64: 8, 16>}, {pipeline_mode = #tpu.pipeline_mode<synchronous>, transform_indices = @transform_3, window_bounds = array<i64: 1, 16>}, {pipeline_mode = #tpu.pipeline_mode<synchronous>, transform_indices = @transform_4, window_bounds = array<i64: 16, 32>}, {pipeline_mode = #tpu.pipeline_mode<synchronous>, transform_indices = @transform_5, window_bounds = array<i64: 1, 32>}, {pipeline_mode = #tpu.pipeline_mode<synchronous>, transform_indices = @transform_6, window_bounds = array<i64: 32, 64>}, {pipeline_mode = #tpu.pipeline_mode<synchronous>, transform_indices = @transform_7, window_bounds = array<i64: 32, 64>}, {pipeline_mode = #tpu.pipeline_mode<synchronous>, transform_indices = @transform_8, window_bounds = array<i64: 1, 64>}, {pipeline_mode = #tpu.pipeline_mode<synchronous>, transform_indices = @transform_9, window_bounds = array<i64: 64, 64>}, {pipeline_mode = #tpu.pipeline_mode<synchronous>, transform_indices = @transform_10, window_bounds = array<i64: 1, 64>}, {pipeline_mode = #tpu.pipeline_mode<synchronous>, transform_indices = @transform_11, window_bounds = array<i64: 64, 64>}, {pipeline_mode = #tpu.pipeline_mode<synchronous>, transform_indices = @transform_12, window_bounds = array<i64: 1, 64>}, {pipeline_mode = #tpu.pipeline_mode<synchronous>, transform_indices = @transform_13, window_bounds = array<i64: 64, 32>}, {pipeline_mode = #tpu.pipeline_mode<synchronous>, transform_indices = @transform_14, window_bounds = array<i64: 1, 32>}, {transform_indices = @transform_15, window_bounds = array<i64: 1, 8, 32>}]} {
    %c0 = arith.constant 0 : index
    %c0_0 = arith.constant 0 : index
    %c0_1 = arith.constant 0 : index
    %0 = vector.load %arg1[%c0, %c0_0, %c0_1] : memref<1x8x8xf32, #tpu.memory_space<vmem>>, vector<1x8x8xf32>
    %1 = vector.shape_cast %0 : vector<1x8x8xf32> to vector<8x8xf32>
    %c0_2 = arith.constant 0 : index
    %c0_3 = arith.constant 0 : index
    %c0_4 = arith.constant 0 : index
    %2 = vector.load %arg2[%c0_2, %c0_3, %c0_4] : memref<1x1x32xf32, #tpu.memory_space<vmem>>, vector<1x1x32xf32>
    %3 = vector.shape_cast %2 : vector<1x1x32xf32> to vector<1x32xf32>
    %c0_5 = arith.constant 0 : index
    %c0_6 = arith.constant 0 : index
    %4 = vector.load %arg3[%c0_5, %c0_6] : memref<8x16xf32, #tpu.memory_space<vmem>>, vector<8x16xf32>
    %cst = arith.constant dense<0.000000e+00> : vector<8x16xf32>
    %5 = tpu.matmul %1, %4, %cst {dimension_numbers = #tpu.dot_dimension_numbers<[1], [0], [0], [1], [0, 0, 1, 1], [], []>} : vector<8x8xf32>, vector<8x16xf32>, vector<8x16xf32> -> vector<8x16xf32>
    %c0_7 = arith.constant 0 : index
    %c0_8 = arith.constant 0 : index
    %6 = vector.load %arg4[%c0_7, %c0_8] : memref<1x16xf32, #tpu.memory_space<vmem>>, vector<1x16xf32>
    %7 = vector.broadcast %6 : vector<1x16xf32> to vector<8x16xf32>
    %8 = arith.addf %5, %7 : vector<8x16xf32>
    %cst_9 = arith.constant 0.000000e+00 : f32
    %9 = vector.broadcast %cst_9 : f32 to vector<8x16xf32>
    %10 = arith.cmpf oge, %8, %9 : vector<8x16xf32>
    %cst_10 = arith.constant 0.00999999977 : f32
    %11 = vector.broadcast %cst_10 : f32 to vector<8x16xf32>
    %12 = arith.mulf %11, %8 : vector<8x16xf32>
    %13 = arith.select %10, %8, %12 : vector<8x16xi1>, vector<8x16xf32>
    %c0_11 = arith.constant 0 : index
    %c0_12 = arith.constant 0 : index
    %14 = vector.load %arg5[%c0_11, %c0_12] : memref<16x32xf32, #tpu.memory_space<vmem>>, vector<16x32xf32>
    %cst_13 = arith.constant dense<0.000000e+00> : vector<8x32xf32>
    %15 = tpu.matmul %13, %14, %cst_13 {dimension_numbers = #tpu.dot_dimension_numbers<[1], [0], [0], [1], [0, 0, 1, 1], [], []>} : vector<8x16xf32>, vector<16x32xf32>, vector<8x32xf32> -> vector<8x32xf32>
    %c0_14 = arith.constant 0 : index
    %c0_15 = arith.constant 0 : index
    %16 = vector.load %arg6[%c0_14, %c0_15] : memref<1x32xf32, #tpu.memory_space<vmem>>, vector<1x32xf32>
    %17 = vector.broadcast %16 : vector<1x32xf32> to vector<8x32xf32>
    %18 = arith.addf %15, %17 : vector<8x32xf32>
    %c0_16 = arith.constant 0 : index
    %c0_17 = arith.constant 0 : index
    %19 = vector.load %arg7[%c0_16, %c0_17] : memref<32x64xf32, #tpu.memory_space<vmem>>, vector<32x64xf32>
    %cst_18 = arith.constant dense<0.000000e+00> : vector<8x64xf32>
    %20 = tpu.matmul %18, %19, %cst_18 {dimension_numbers = #tpu.dot_dimension_numbers<[1], [0], [0], [1], [0, 0, 1, 1], [], []>} : vector<8x32xf32>, vector<32x64xf32>, vector<8x64xf32> -> vector<8x64xf32>
    %c0_19 = arith.constant 0 : index
    %c0_20 = arith.constant 0 : index
    %21 = vector.load %arg8[%c0_19, %c0_20] : memref<32x64xf32, #tpu.memory_space<vmem>>, vector<32x64xf32>
    %cst_21 = arith.constant dense<0.000000e+00> : vector<1x64xf32>
    %22 = tpu.matmul %3, %21, %cst_21 {dimension_numbers = #tpu.dot_dimension_numbers<[1], [0], [0], [1], [0, 0, 1, 1], [], []>} : vector<1x32xf32>, vector<32x64xf32>, vector<1x64xf32> -> vector<1x64xf32>
    %23 = vector.shape_cast %20 : vector<8x64xf32> to vector<1x8x64xf32>
    %24 = vector.shape_cast %22 : vector<1x64xf32> to vector<1x1x64xf32>
    %25 = vector.broadcast %24 : vector<1x1x64xf32> to vector<1x8x64xf32>
    %26 = arith.addf %23, %25 : vector<1x8x64xf32>
    %c0_22 = arith.constant 0 : index
    %c0_23 = arith.constant 0 : index
    %27 = vector.load %arg9[%c0_22, %c0_23] : memref<1x64xf32, #tpu.memory_space<vmem>>, vector<1x64xf32>
    %28 = vector.shape_cast %27 : vector<1x64xf32> to vector<1x1x64xf32>
    %29 = vector.broadcast %28 : vector<1x1x64xf32> to vector<1x8x64xf32>
    %30 = arith.addf %26, %29 : vector<1x8x64xf32>
    %31 = vector.shape_cast %30 : vector<1x8x64xf32> to vector<8x64xf32>
    %cst_24 = arith.constant 0.000000e+00 : f32
    %32 = vector.broadcast %cst_24 : f32 to vector<8x64xf32>
    %33 = arith.cmpf oge, %31, %32 : vector<8x64xf32>
    %cst_25 = arith.constant 0.00999999977 : f32
    %34 = vector.broadcast %cst_25 : f32 to vector<8x64xf32>
    %35 = arith.mulf %34, %31 : vector<8x64xf32>
    %36 = arith.select %33, %31, %35 : vector<8x64xi1>, vector<8x64xf32>
    %c0_26 = arith.constant 0 : index
    %c0_27 = arith.constant 0 : index
    %37 = vector.load %arg10[%c0_26, %c0_27] : memref<64x64xf32, #tpu.memory_space<vmem>>, vector<64x64xf32>
    %cst_28 = arith.constant dense<0.000000e+00> : vector<8x64xf32>
    %38 = tpu.matmul %36, %37, %cst_28 {dimension_numbers = #tpu.dot_dimension_numbers<[1], [0], [0], [1], [0, 0, 1, 1], [], []>} : vector<8x64xf32>, vector<64x64xf32>, vector<8x64xf32> -> vector<8x64xf32>
    %c0_29 = arith.constant 0 : index
    %c0_30 = arith.constant 0 : index
    %39 = vector.load %arg11[%c0_29, %c0_30] : memref<1x64xf32, #tpu.memory_space<vmem>>, vector<1x64xf32>
    %40 = vector.broadcast %39 : vector<1x64xf32> to vector<8x64xf32>
    %41 = arith.addf %38, %40 : vector<8x64xf32>
    %cst_31 = arith.constant 0.000000e+00 : f32
    %42 = vector.broadcast %cst_31 : f32 to vector<8x64xf32>
    %43 = arith.cmpf oge, %41, %42 : vector<8x64xf32>
    %cst_32 = arith.constant 0.00999999977 : f32
    %44 = vector.broadcast %cst_32 : f32 to vector<8x64xf32>
    %45 = arith.mulf %44, %41 : vector<8x64xf32>
    %46 = arith.select %43, %41, %45 : vector<8x64xi1>, vector<8x64xf32>
    %c0_33 = arith.constant 0 : index
    %c0_34 = arith.constant 0 : index
    %47 = vector.load %arg12[%c0_33, %c0_34] : memref<64x64xf32, #tpu.memory_space<vmem>>, vector<64x64xf32>
    %cst_35 = arith.constant dense<0.000000e+00> : vector<8x64xf32>
    %48 = tpu.matmul %46, %47, %cst_35 {dimension_numbers = #tpu.dot_dimension_numbers<[1], [0], [0], [1], [0, 0, 1, 1], [], []>} : vector<8x64xf32>, vector<64x64xf32>, vector<8x64xf32> -> vector<8x64xf32>
    %c0_36 = arith.constant 0 : index
    %c0_37 = arith.constant 0 : index
    %49 = vector.load %arg13[%c0_36, %c0_37] : memref<1x64xf32, #tpu.memory_space<vmem>>, vector<1x64xf32>
    %50 = vector.broadcast %49 : vector<1x64xf32> to vector<8x64xf32>
    %51 = arith.addf %48, %50 : vector<8x64xf32>
    %cst_38 = arith.constant 0.000000e+00 : f32
    %52 = vector.broadcast %cst_38 : f32 to vector<8x64xf32>
    %53 = arith.cmpf oge, %51, %52 : vector<8x64xf32>
    %cst_39 = arith.constant 0.00999999977 : f32
    %54 = vector.broadcast %cst_39 : f32 to vector<8x64xf32>
    %55 = arith.mulf %54, %51 : vector<8x64xf32>
    %56 = arith.select %53, %51, %55 : vector<8x64xi1>, vector<8x64xf32>
    %c0_40 = arith.constant 0 : index
    %c0_41 = arith.constant 0 : index
    %57 = vector.load %arg14[%c0_40, %c0_41] : memref<64x32xf32, #tpu.memory_space<vmem>>, vector<64x32xf32>
    %cst_42 = arith.constant dense<0.000000e+00> : vector<8x32xf32>
    %58 = tpu.matmul %56, %57, %cst_42 {dimension_numbers = #tpu.dot_dimension_numbers<[1], [0], [0], [1], [0, 0, 1, 1], [], []>} : vector<8x64xf32>, vector<64x32xf32>, vector<8x32xf32> -> vector<8x32xf32>
    %c0_43 = arith.constant 0 : index
    %c0_44 = arith.constant 0 : index
    %59 = vector.load %arg15[%c0_43, %c0_44] : memref<1x32xf32, #tpu.memory_space<vmem>>, vector<1x32xf32>
    %60 = vector.broadcast %59 : vector<1x32xf32> to vector<8x32xf32>
    %61 = arith.addf %58, %60 : vector<8x32xf32>
    %62 = vector.shape_cast %61 : vector<8x32xf32> to vector<1x8x32xf32>
    %c0_45 = arith.constant 0 : index
    %c0_46 = arith.constant 0 : index
    %c0_47 = arith.constant 0 : index
    %63 = vector.load %arg16[%c0_45, %c0_46, %c0_47] : memref<1x8x32xf32, #tpu.memory_space<vmem>>, vector<1x8x32xf32>
    tpu.vector_store %arg16[%c0_45, %c0_46, %c0_47], %62 {strides = array<i32>} : memref<1x8x32xf32, #tpu.memory_space<vmem>>, vector<1x8x32xf32>,
    return
  }
  func.func @transform_0(%arg0: i32) -> (i32, i32, i32) {
    %c0_i32 = arith.constant 0 : i32
    %c0_i32_0 = arith.constant 0 : i32
    %c0_i32_1 = arith.constant 0 : i32
    return %arg0, %c0_i32, %c0_i32_0 : i32, i32, i32
  }
  func.func @transform_1(%arg0: i32) -> (i32, i32, i32) {
    %c0_i32 = arith.constant 0 : i32
    %c0_i32_0 = arith.constant 0 : i32
    %c0_i32_1 = arith.constant 0 : i32
    return %arg0, %c0_i32, %c0_i32_0 : i32, i32, i32
  }
  func.func @transform_2(%arg0: i32) -> (i32, i32) {
    %c0_i32 = arith.constant 0 : i32
    %c0_i32_0 = arith.constant 0 : i32
    %c0_i32_1 = arith.constant 0 : i32
    return %c0_i32, %c0_i32_0 : i32, i32
  }
  func.func @transform_3(%arg0: i32) -> (i32, i32) {
    %c0_i32 = arith.constant 0 : i32
    %c0_i32_0 = arith.constant 0 : i32
    %c0_i32_1 = arith.constant 0 : i32
    return %c0_i32, %c0_i32_0 : i32, i32
  }
  func.func @transform_4(%arg0: i32) -> (i32, i32) {
    %c0_i32 = arith.constant 0 : i32
    %c0_i32_0 = arith.constant 0 : i32
    %c0_i32_1 = arith.constant 0 : i32
    return %c0_i32, %c0_i32_0 : i32, i32
  }
  func.func @transform_5(%arg0: i32) -> (i32, i32) {
    %c0_i32 = arith.constant 0 : i32
    %c0_i32_0 = arith.constant 0 : i32
    %c0_i32_1 = arith.constant 0 : i32
    return %c0_i32, %c0_i32_0 : i32, i32
  }
  func.func @transform_6(%arg0: i32) -> (i32, i32) {
    %c0_i32 = arith.constant 0 : i32
    %c0_i32_0 = arith.constant 0 : i32
    %c0_i32_1 = arith.constant 0 : i32
    return %c0_i32, %c0_i32_0 : i32, i32
  }
  func.func @transform_7(%arg0: i32) -> (i32, i32) {
    %c0_i32 = arith.constant 0 : i32
    %c0_i32_0 = arith.constant 0 : i32
    %c0_i32_1 = arith.constant 0 : i32
    return %c0_i32, %c0_i32_0 : i32, i32
  }
  func.func @transform_8(%arg0: i32) -> (i32, i32) {
    %c0_i32 = arith.constant 0 : i32
    %c0_i32_0 = arith.constant 0 : i32
    %c0_i32_1 = arith.constant 0 : i32
    return %c0_i32, %c0_i32_0 : i32, i32
  }
  func.func @transform_9(%arg0: i32) -> (i32, i32) {
    %c0_i32 = arith.constant 0 : i32
    %c0_i32_0 = arith.constant 0 : i32
    %c0_i32_1 = arith.constant 0 : i32
    return %c0_i32, %c0_i32_0 : i32, i32
  }
  func.func @transform_10(%arg0: i32) -> (i32, i32) {
    %c0_i32 = arith.constant 0 : i32
    %c0_i32_0 = arith.constant 0 : i32
    %c0_i32_1 = arith.constant 0 : i32
    return %c0_i32, %c0_i32_0 : i32, i32
  }
  func.func @transform_11(%arg0: i32) -> (i32, i32) {
    %c0_i32 = arith.constant 0 : i32
    %c0_i32_0 = arith.constant 0 : i32
    %c0_i32_1 = arith.constant 0 : i32
    return %c0_i32, %c0_i32_0 : i32, i32
  }
  func.func @transform_12(%arg0: i32) -> (i32, i32) {
    %c0_i32 = arith.constant 0 : i32
    %c0_i32_0 = arith.constant 0 : i32
    %c0_i32_1 = arith.constant 0 : i32
    return %c0_i32, %c0_i32_0 : i32, i32
  }
  func.func @transform_13(%arg0: i32) -> (i32, i32) {
    %c0_i32 = arith.constant 0 : i32
    %c0_i32_0 = arith.constant 0 : i32
    %c0_i32_1 = arith.constant 0 : i32
    return %c0_i32, %c0_i32_0 : i32, i32
  }
  func.func @transform_14(%arg0: i32) -> (i32, i32) {
    %c0_i32 = arith.constant 0 : i32
    %c0_i32_0 = arith.constant 0 : i32
    %c0_i32_1 = arith.constant 0 : i32
    return %c0_i32, %c0_i32_0 : i32, i32
  }
  func.func @transform_15(%arg0: i32) -> (i32, i32, i32) {
    %c0_i32 = arith.constant 0 : i32
    %c0_i32_0 = arith.constant 0 : i32
    %c0_i32_1 = arith.constant 0 : i32
    return %arg0, %c0_i32, %c0_i32_0 : i32, i32, i32
  }
}

</mosaic_0001>

<bundles_post_ra>
// kernel: tpu_custom_call.1
= control target key start
LH: loop header
LB: loop body
LE: loop exit
PB: predicated region body
PF: predicated region fallthrough
CT: control target
= control target key end

     0   :  { %s1910_s0 = inlined_call_operand.hbm [shape: f32[2,8,8], index: 0, kind: input, shape index: {}]   ;;  %s1911_s1 = inlined_call_operand.hbm [shape: f32[2,1,32], index: 1, kind: input, shape index: {}]   ;;  %s1912_s2 = inlined_call_operand.vmem [shape: f32[8,16], index: 2, kind: input, shape index: {}]   ;;  %s1913_s3 = inlined_call_operand.hbm [shape: f32[1,16], index: 3, kind: input, shape index: {}]   ;;  %s1914_s4 = inlined_call_operand.hbm [shape: f32[16,32], index: 4, kind: input, shape index: {}]   ;;  %s1915_s5 = inlined_call_operand.hbm [shape: f32[1,32], index: 5, kind: input, shape index: {}]   ;;  %s1916_s6 = inlined_call_operand.vmem [shape: f32[32,64], index: 6, kind: input, shape index: {}]   ;;  %s1917_s7 = inlined_call_operand.hbm [shape: f32[32,64], index: 7, kind: input, shape index: {}]   ;;  %s1918_s8 = inlined_call_operand.hbm [shape: f32[1,64], index: 8, kind: input, shape index: {}]   ;;  %s1919_s9 = inlined_call_operand.vmem [shape: f32[64,64], index: 9, kind: input, shape index: {}]   ;;  %s1920_s10 = inlined_call_operand.vmem [shape: f32[1,64], index: 10, kind: input, shape index: {}]   ;;  %s1921_s11 = inlined_call_operand.hbm [shape: f32[64,64], index: 11, kind: input, shape index: {}]   ;;  %s1922_s12 = inlined_call_operand.vmem [shape: f32[1,64], index: 12, kind: input, shape index: {}]   ;;  %s1923_s13 = inlined_call_operand.vmem [shape: f32[64,32], index: 13, kind: input, shape index: {}]   ;;  %s1924_s14 = inlined_call_operand.vmem [shape: f32[1,32], index: 14, kind: input, shape index: {}]   ;;  %s1925_s15 = inlined_call_operand.hbm [shape: f32[2,8,32], index: 15, kind: output, shape index: {}]  }
   0x1   :  { %1930 = sst [smem:[#allocation27_spill]] %s1913_s3 }
   0x2   :  { %1931 = sst [smem:[#allocation28_spill]] %s1914_s4 }
   0x3   :  { %1932 = sst [smem:[#allocation29_spill]] %s1915_s5 }
   0x4   :  { %1933 = sst [smem:[#allocation30_spill]] %s1917_s7 }
   0x5   :  { %1934 = sst [smem:[#allocation31_spill]] %s1918_s8 }
   0x6   :  { %1935 = sst [smem:[#allocation32_spill]] %s1920_s10 }
   0x7   :  { %1936 = sst [smem:[#allocation33_spill]] %s1921_s11 }
   0x8   :  { %1937 = sst [smem:[#allocation34_spill]] %s1922_s12 }
   0x9   :  { %1938 = sst [smem:[#allocation35_spill]] %s1924_s14 }
   0xa   :  { %1939 = sst [smem:[#allocation36_spill]] %s1925_s15 }
   0xb   :  { %20 = vsyncpa [#allocation3], 0 }
   0xc   :  { %22 = vsyncpa [#allocation3 + $0x1], 0 }
   0xd   :  { %23 = vsyncpa [#allocation6], 0 }
   0xe   :  { %25 = vsyncpa [#allocation6 + $0x1], 0 }
   0xf   :  { %26 = vsyncpa [#allocation9], 0 }
  0x10   :  { %27 = vsyncpa [#allocation12], 0 }
  0x11   :  { %28 = vsyncpa [#allocation15], 0 }
  0x12   :  { %29 = vsyncpa [#allocation4], 0 }
  0x13   :  { %31 = vsyncpa [#allocation4 + $0x1], 0  ;;  %s1611_s18 = smov 0   ;;  %s1613_s19 = smov 0  }
  0x14   :  { %s1615_s20 = smov 0   ;;  %s1617_s21 = smov 0  }
  0x15 LB: > { %1940 = sst [smem:[#allocation24_spill]] %s1517_s20  ;;  %s1635_s25 = sadd.s32 4294967295, %s1521_s21   ;;  %s1521_s21 = sphi %s1617_s21, %s1961_s21   ;;  %s1517_s20 = sphi %s1615_s20, %s1963_s20   ;;  %s1513_s19 = sphi %s1613_s19, %s1965_s19   ;;  %s1509_s18 = sphi %s1611_s18, %s1964_s18  }
  0x16   : > { %s1941_s3 = sld [smem:[#allocation27_spill]]  ;;  %p1045_p0 = scmp.ge.s32.totalorder %s1521_s21, 1 }
  0x17   : > { %p58_p1 = scmp.eq.s32.totalorder %s1635_s25, 0  ;;  %p393_p2 = scmp.lt.s32.totalorder %s1521_s21, 3 }
  0x18   : > { %s1523_s27 = smov [#allocation7]   ;;  %s1943_s4 = sld [smem:[#allocation28_spill]] }
  0x19   : > { %p1640_p3 = pnand %p1045_p0, %p393_p2  ;;  %s410_s28 = sshll.u32 %s1523_s27, 4  ;;  %s411_s28 = int_to_ptr.vmem [resolvable:$true] %s410_s28 }
  0x1a   : > { %s1524_s22 = smov [#allocation8]   ;;  %s1525_s27 = smov 128  }
  0x1b   : > { %p1105_p5 = pneg %p1640_p3  ;;  %s421_s23 = sshll.u32 %s1524_s22, 4  ;;  %s422_s23 = int_to_ptr.vmem [resolvable:$true] %s421_s23 }
  0x1c   : > { %s408_s24 = sshll.u32 %s1941_s3, 4  ;;  %s1526_s3 = smov 8   ;;  %s409_s24 = int_to_ptr.hbm [resolvable:$true] %s408_s24 }
  0x1d   : > { %p1652_p6 = pnand %p1105_p5, %p58_p1  ;;  %s1945_s7 = sld [smem:[#allocation30_spill]] }
  0x1e   : > { %s419_s16 = sshll.u32 %s1943_s4, 4  ;;  %s1527_s14 = smov [#allocation11]   ;;  %s420_s16 = int_to_ptr.hbm [resolvable:$true] %s419_s16 }
  0x1f   : > { %1108 = dma.hbm_to_vmem [thread:$0]  (!%p1652_p6), %s409_s24, 16, %s411_s28, [#allocation6]  }
  0x20   : > { %1111 = dma.hbm_to_vmem [thread:$0]  (!%p1652_p6), %s420_s16, 256, %s422_s23, [#allocation9], %s1525_s27, %s1525_s27, %s1526_s3  }
  0x21   : > { %s450_s15 = sshll.u32 %s1527_s14, 4  ;;  %s1946_s5 = sld [smem:[#allocation29_spill]]  ;;  %s451_s15 = int_to_ptr.vmem [resolvable:$true] %s450_s15 }
  0x22   : > { %s1528_s24 = smov [#allocation10]   ;;  %s1947_s8 = sld [smem:[#allocation31_spill]] }
  0x23   : > { %s448_s4 = sshll.u32 %s1945_s7, 4  ;;  %s436_s28 = sshll.u32 %s1528_s24, 4  ;;  %s449_s4 = int_to_ptr.hbm [resolvable:$true] %s448_s4  ;;  %s437_s28 = int_to_ptr.vmem [resolvable:$true] %s436_s28 }
  0x24   : > { %1117 = dma.hbm_to_vmem [thread:$0]  (!%p1652_p6), %s449_s4, 512, %s451_s15, [#allocation12], %s1525_s27, %s1525_s27, %s1526_s3  }
  0x25   : > { %s1948_s11 = sld [smem:[#allocation33_spill]]  ;;  %s1529_s14 = smov [#allocation13]  }
  0x26   : > { %s465_s15 = sshll.u32 %s1529_s14, 4  ;;  %s1530_s30 = smov [#allocation14]   ;;  %s466_s15 = int_to_ptr.vmem [resolvable:$true] %s465_s15 }
  0x27   : > { %s434_s22 = sshll.u32 %s1946_s5, 4  ;;  %s1044_s24 = sadd.s32 4294967294, %s1521_s21   ;;  %s435_s22 = int_to_ptr.hbm [resolvable:$true] %s434_s22 }
  0x28   : > { %s463_s29 = sshll.u32 %s1947_s8, 4  ;;  %s44_s23 = sadd.s32 1, %s1517_s20  ;;  %s464_s29 = int_to_ptr.hbm [resolvable:$true] %s463_s29 }
  0x29   : > { %1114 = dma.hbm_to_vmem [thread:$0]  (!%p1652_p6), %s435_s22, 16, %s437_s28, [#allocation9]  }
  0x2a   : > { %1120 = dma.hbm_to_vmem [thread:$0]  (!%p1652_p6), %s464_s29, 16, %s466_s15, [#allocation12]  }
  0x2b   : > { %s480_s4 = sshll.u32 %s1948_s11, 4  ;;  %s482_s22 = sshll.u32 %s1530_s30, 4  ;;  %s481_s4 = int_to_ptr.hbm [resolvable:$true] %s480_s4  ;;  %s483_s22 = int_to_ptr.vmem [resolvable:$true] %s482_s22 }
  0x2c   : > { %1123 = dma.hbm_to_vmem [thread:$0]  (!%p1652_p6), %s481_s4, 1024, %s483_s22, [#allocation15], %s1525_s27, %s1525_s27, %s1526_s3  }
  0x2d   : > { %s1682_s28 = sadd.s32 1, %s1521_s21   ;;  %p51_p8 = scmp.ne.s32.totalorder %s1517_s20, %s1513_s19 }
  0x2e   : > { %1949 = sst [smem:[#allocation25_spill]] %s1682_s28  ;;  %s41_s16 = ssub.s32 %s1521_s21, %s1682_s28 }
  0x2f   : > { %p42_p7 = scmp.eq.s32.totalorder %s41_s16, 0  ;;  %p52_p9 = scmp.eq.s32.totalorder %s1521_s21, 0 }
  0x30   : > { %p57_p10 = scmp.ne.s32.totalorder %s1513_s19, %s1509_s18  ;;  %p380_p13 = scmp.eq.s32.totalorder %s1635_s25, 1 }
  0x31   : > { %s1693_s29 = scalar_select %p42_p7, %s1517_s20, %s44_s23  }
  0x32   : > { %p1695_p11 = por %p52_p9, %p51_p8  ;;  %p1701_p12 = por %p58_p1, %p57_p10 }
  0x33   : > { %1950 = sst [smem:[#allocation26_spill]] %s1693_s29  ;;  %p386_p0 = scmp.eq.s32.totalorder %s1044_s24, 1 }
  0x34   : > { %p1141_p2 = scmp.lt.s32.totalorder %s1521_s21, 2  ;;  %s1708_s17 = sand.u32 1, %s1517_s20  }
  0x35   : > { %p1710_p5 = por %p380_p13, %p51_p8  ;;  %p1714_p6 = por %p386_p0, %p57_p10 }
  0x36   : > { %s1053_s4 = sshll.u32 %s1708_s17, 3  ;;  %s1054_s14 = sshll.u32 %s1521_s21, 3 }
  0x37   : > { %s513_s22 = scalar_lea.hbm %s1910_s0, %s1054_s14  ;;  %s509_s24 = scalar_lea.vmem [#allocation2], %s1053_s4 }
  0x38   : > { %s517_s16 = sshll.u32 %s509_s24, 4  ;;  %s515_s23 = sshll.u32 %s513_s22, 4  ;;  %s518_s16 = int_to_ptr.vmem [resolvable:$true] %s517_s16  ;;  %s516_s23 = int_to_ptr.hbm [resolvable:$true] %s515_s23 }
  0x39   : > { %p1725_p7 = pnand %p1141_p2, %p1695_p11  ;;  %s524_s7 = sand.u32 1, %s1521_s21  }
  0x3a   : > { %s506_s8 = scalar_lea.sflag [#allocation3], %s1708_s17  ;;  %s1375_s11 = sshra.s32 %s516_s23, 4  ;;  %s1376_s11 = int_to_ptr.hbm [resolvable:$true] %s1375_s11 }
  0x3b   : > { %s1377_s29 = scalar_lea.hbm %s1376_s11, 8  ;;  %p1379_p9 = pneg %p1725_p7 }
  0x3c   : > { %p1378_p8 = scmp.ne.s32.totalorder %s1376_s11, %s1377_s29  ;;  %s1382_s14 = scalar_lea.hbm %s1910_s0, 16 }
  0x3d   : > { %p1383_p11 = scmp.lt.s32.totalorder %s1376_s11, %s1910_s0  ;;  %p1384_p0 = scmp.lt.s32.totalorder %s1382_s14, %s1377_s29 }
  0x3e   : > { %p1380_p10 = pnand %p1379_p9, %p1378_p8 }
  0x3f   : > { %p1385_p2 = por %p1384_p0, %p1383_p11 }
  0x40   : > { %p1381_p13 = pneg %p1380_p10 }
  0x42   : > { %p1386_p4 = pnand %p1385_p2, %p1381_p13 }
  0x44   : > { %1389 = shalt.err (!%p1386_p4)
}
  0x45   : > { %1127 = dma.hbm_to_vmem [thread:$0]  (!%p1725_p7), %s516_s23, 128, %s518_s16, %s506_s8  }
  0x46   : > { %s530_s20 = scalar_lea.hbm %s1911_s1, %s1521_s21  ;;  %s527_s4 = scalar_lea.vmem [#allocation5], %s1708_s17 }
  0x47   : > { %s534_s10 = sshll.u32 %s527_s4, 4  ;;  %s532_s28 = sshll.u32 %s530_s20, 4  ;;  %s535_s10 = int_to_ptr.vmem [resolvable:$true] %s534_s10  ;;  %s533_s28 = int_to_ptr.hbm [resolvable:$true] %s532_s28 }
  0x48   : > { %s525_s11 = scalar_lea.sflag [#allocation6], %s524_s7  ;;  %s1405_s29 = sshra.s32 %s533_s28, 4  ;;  %s1406_s29 = int_to_ptr.hbm [resolvable:$true] %s1405_s29 }
  0x49   : > { %s1407_s14 = scalar_lea.hbm %s1406_s29, 1  ;;  %s1412_s16 = scalar_lea.hbm %s1911_s1, 2 }
  0x4a   : > { %p1408_p4 = scmp.ne.s32.totalorder %s1406_s29, %s1407_s14  ;;  %p1413_p13 = scmp.lt.s32.totalorder %s1406_s29, %s1911_s1 }
  0x4b   : > { %p1414_p11 = scmp.lt.s32.totalorder %s1412_s16, %s1407_s14 }
  0x4c   : > { %p1410_p8 = pnand %p1408_p4, %p1379_p9 }
  0x4d   : > { %p1415_p0 = por %p1414_p11, %p1413_p13 }
  0x4e   : > { %p1411_p10 = pneg %p1410_p8 }
  0x50   : > { %p1416_p2 = pnand %p1415_p0, %p1411_p10 }
  0x52   : > { %1419 = shalt.err (!%p1416_p2)
}
  0x53   : > { %1130 = dma.hbm_to_vmem [thread:$0]  (!%p1725_p7), %s533_s28, 16, %s535_s10, %s525_s11  }
  0x54   : > { %543 = sbr.rel (%p1640_p3) target bundleno = 910 (0x38e), region = 80  ;;  %s1763_s7 = sand.u32 (!%p1640_p3), 1, %s1513_s19  }
  0x55   : > { %s1056_s20 = sshll.u32 (!%p1640_p3), %s1763_s7, 3  ;;  %s546_s17 = scalar_lea.sflag (!%p1640_p3), [#allocation3], %s1763_s7 }
  0x56   : > { %s549_s22 = scalar_lea.vmem (!%p1640_p3), [#allocation2], %s1056_s20 }
  0x59   : > { %1480 = dma.done.wait (%p1701_p12), %s546_s17, 128  }
  0x5a   : > { %1482 = vsyncadd (%p1701_p12), %s546_s17, 4294967168  ;;  %s555_s5 = sand.u32 1, %s1635_s25   ;;  %s558_s28 = scalar_lea.vmem [#allocation5], %s1763_s7 }
  0x5b   : > { %s556_s26 = scalar_lea.sflag [#allocation6], %s555_s5 }
  0x5c   : > { %1484 = dma.done.wait (%p1701_p12), %s556_s26, 16  }
  0x5d   : > { %1486 = vsyncadd (%p1701_p12), %s556_s26, 4294967280 }
  0x5e   : > { %1488 = dma.done.wait (%p58_p1), [#allocation6], 16  }
  0x5f   : > { %1490 = vsyncadd (%p58_p1), [#allocation6], 4294967280 }
  0x60   : > { %1492 = dma.done.wait (%p58_p1), [#allocation9], 272  }
  0x61   : > { %1494 = vsyncadd (%p58_p1), [#allocation9], 4294967024 }
  0x62   : > { %1496 = dma.done.wait (%p58_p1), [#allocation12], 528  }
  0x63   : > { %1498 = vsyncadd (%p58_p1), [#allocation12], 4294966768 }
  0x64   : > { %1500 = dma.done.wait (%p58_p1), [#allocation15], 1024  }
  0x65   : > { %1502 = vsyncadd (%p58_p1), [#allocation15], 4294966272  ;;  %vm647_vm0 = vcmask 64512   ;;  %v642_v0 = vld [vmem:[%s1912_s2] sm:$0xff]  ;;  %v674_v3 = vld [vmem:[#allocation8] sm:$0xff]  ;;  %vm680_vm2 = vcmask 130048  }
  0x66   : > { %v640_v1 = vld [vmem:[%s549_s22] sm:$0xff]  ;;  %666 = vmatpush.msra.mxu0 %v642_v0  ;;  %v707_v4 = vld [vmem:[%s1916_s6 + $0x18] sm:$0xff]  ;;  %v706_v5 = vld [vmem:[%s1916_s6 + $0x10] sm:$0xff]  ;;  %vm708_vm3 = vcmask 261120   ;;  %vm781_vm5 = vcmask 523264   ;;  %s1956_s11 = sld [smem:[#allocation32_spill]] }
  0x67   : > { %1064 = vmatmul.msk.f32.vlgmr.msra.gmra.mxu0 %vm647_vm0, %v640_v1  ;;  %v675_v2 = vld [vmem:[#allocation8 + $0x8] sm:$0xff]  ;;  %724 = vmatpush.msra.mxu3 %v707_v4  ;;  %v1189_v6 = vld [vmem:[#allocation7] ss:$0 sm:$0xff]  ;;  %v705_v11 = vld [vmem:[%s1916_s6 + $0x8] sm:$0xff]  ;;  %s1957_s22 = sld [smem:[#allocation34_spill]]  ;;  %s1072_s5 = sshll.u32 %s1635_s25, 3 }
  0x68   : > { %698 = vmatpush.msra.mxu1 %v675_v2  ;;  %v704_v12 = vld [vmem:[%s1916_s6] sm:$0xff]  ;;  %v734_v14 = vld [vmem:[#allocation11 + $0x10] sm:$0xff]  ;;  %v733_v15 = vld [vmem:[#allocation11 + $0x8] sm:$0xff]  ;;  %s1958_s24 = sld [smem:[#allocation36_spill]]  ;;  %s639_s29 = scalar_lea.vmem [#allocation16], %s1056_s20 }
  0x69   : > { %725 = vmatpush.msra.mxu3 %v706_v5  ;;  %v735_v13 = vld [vmem:[#allocation11 + $0x18] sm:$0xff]  ;;  %v732_v16 = vld [vmem:[#allocation11] sm:$0xff]  ;;  %v775_v22 = vld [vmem:[%s1919_s9 + $0x30] sm:$0xff]  ;;  %s895_s14 = sshll.u32 %s639_s29, 4  ;;  %s883_s25 = scalar_lea.sflag [#allocation4], %s1763_s7  ;;  %s896_s14 = int_to_ptr.vmem [resolvable:$true] %s895_s14 }
  0x6a   : > { %699 = vmatpush.msra.mxu1 %v674_v3  ;;  %v1190_v17 = vld [vmem:[#allocation10] ss:$0 sm:$0xff]  ;;  %v641_v20 = vld [vmem:[%s558_s28] sm:$0x1]  ;;  %v776_v21 = vld [vmem:[%s1919_s9 + $0x38] sm:$0xff] }
  0x6b   : > { %726 = vmatpush.msra.mxu3 %v705_v11  ;;  %793 = vmatpush.msrb.mxu0 %v776_v21  ;;  %v774_v23 = vld [vmem:[%s1919_s9 + $0x28] sm:$0xff]  ;;  %v773_v24 = vld [vmem:[%s1919_s9 + $0x20] sm:$0xff]  ;;  %v772_v25 = vld [vmem:[%s1919_s9 + $0x18] sm:$0xff] }
  0x6c   : > { %v771_v26 = vld [vmem:[%s1919_s9 + $0x10] sm:$0xff]  ;;  %v770_v27 = vld [vmem:[%s1919_s9 + $0x8] sm:$0xff]  ;;  %v769_v28 = vld [vmem:[%s1919_s9] sm:$0xff] }
  0x6d   : > { %727 = vmatpush.msra.mxu3 %v704_v12  ;;  %794 = vmatpush.msrb.mxu0 %v775_v22  ;;  %v815_v29 = vld [vmem:[#allocation14 + $0x38] sm:$0xff]  ;;  %v814_v30 = vld [vmem:[#allocation14 + $0x30] sm:$0xff]  ;;  %v813_v31 = vld [vmem:[#allocation14 + $0x28] sm:$0xff] }
  0x6e   : > { %831 = vmatpush.msrb.mxu1 %v815_v29  ;;  %v812_v32 = vld [vmem:[#allocation14 + $0x20] sm:$0xff]  ;;  %v811_v33 = vld [vmem:[#allocation14 + $0x18] sm:$0xff]  ;;  %v810_v42 = vld [vmem:[#allocation14 + $0x10] sm:$0xff]  ;;  %s893_s28 = scalar_lea.hbm %s1958_s24, %s1072_s5  ;;  %s1455_s20 = scalar_lea.hbm %s1958_s24, 16 }
  0x6f   : > { %751 = vmatpush.msrb.mxu3 %v735_v13  ;;  %795 = vmatpush.msrb.mxu0 %v774_v23  ;;  %v1191_v37 = vld [vmem:[#allocation13] ss:$0 sm:$0xff]  ;;  %v809_v43 = vld [vmem:[#allocation14 + $0x8] sm:$0xff]  ;;  %v808_v44 = vld [vmem:[#allocation14] sm:$0xff]  ;;  %s897_s15 = sshll.u32 %s893_s28, 4  ;;  %s898_s15 = int_to_ptr.hbm [resolvable:$true] %s897_s15 }
  0x70   : > { %832 = vmatpush.msrb.mxu1 %v814_v30  ;;  %v853_v45 = vld [vmem:[%s1923_s13 + $0x38] sm:$0xff]  ;;  %v852_v46 = vld [vmem:[%s1923_s13 + $0x30] sm:$0xff]  ;;  %v851_v47 = vld [vmem:[%s1923_s13 + $0x28] sm:$0xff]  ;;  %s1449_s8 = sshra.s32 %s898_s15, 4  ;;  %s1450_s8 = int_to_ptr.hbm [resolvable:$true] %s1449_s8 }
  0x71   : > { %752 = vmatpush.msrb.mxu3 %v734_v14  ;;  %796 = vmatpush.msrb.mxu0 %v773_v24  ;;  %v850_v48 = vld [vmem:[%s1923_s13 + $0x20] sm:$0xff]  ;;  %v849_v49 = vld [vmem:[%s1923_s13 + $0x18] sm:$0xff]  ;;  %v848_v55 = vld [vmem:[%s1923_s13 + $0x10] sm:$0xff]  ;;  %s1451_s16 = scalar_lea.hbm %s1450_s8, 8  ;;  %p1456_p7 = scmp.lt.s32.totalorder %s1450_s8, %s1958_s24 }
  0x72   : > { %833 = vmatpush.msrb.mxu1 %v813_v31  ;;  %869 = vmatpush.msra.mxu2 %v853_v45  ;;  %v1192_v50 = vld [vmem:[%s1956_s11] ss:$0 sm:$0xff]  ;;  %v847_v56 = vld [vmem:[%s1923_s13 + $0x8] sm:$0xff]  ;;  %s1959_s11 = sld [smem:[#allocation35_spill]]  ;;  %p1452_p1 = scmp.ne.s32.totalorder %s1450_s8, %s1451_s16 }
  0x73   : > { %753 = vmatpush.msrb.mxu3 %v733_v15  ;;  %797 = vmatpush.msrb.mxu0 %v772_v25  ;;  %v846_v57 = vld [vmem:[%s1923_s13] sm:$0xff]  ;;  %p1457_p9 = scmp.lt.s32.totalorder %s1455_s20, %s1451_s16 }
  0x74   : > { %834 = vmatpush.msrb.mxu1 %v812_v32  ;;  %870 = vmatpush.msra.mxu2 %v852_v46  ;;  %v1193_v58 = vld [vmem:[%s1957_s22] ss:$0 sm:$0xff]  ;;  %p1453_p3 = pnand %p1452_p1, %p1710_p5 }
  0x75   : > { %754 = vmatpush.msrb.mxu3 %v732_v16  ;;  %798 = vmatpush.msrb.mxu0 %v771_v26  ;;  %p1458_p4 = por %p1457_p9, %p1456_p7 }
  0x76   : > { %835 = vmatpush.msrb.mxu1 %v811_v33  ;;  %871 = vmatpush.msra.mxu2 %v851_v47  ;;  %p1454_p12 = pneg %p1453_p3 }
  0x77   : > { %799 = vmatpush.msrb.mxu0 %v770_v27 }
  0x78   : > { %836 = vmatpush.msrb.mxu1 %v810_v42  ;;  %872 = vmatpush.msra.mxu2 %v850_v48  ;;  %v1194_v63 = vld [vmem:[%s1959_s11] ss:$0 sm:$0xff]  ;;  %p1459_p8 = pnand %p1458_p4, %p1454_p12 }
  0x79   : > { %800 = vmatpush.msrb.mxu0 %v769_v28 }
  0x7a   : > { %837 = vmatpush.msrb.mxu1 %v809_v43  ;;  %873 = vmatpush.msra.mxu2 %v849_v49 }
  0x7c   : > { %838 = vmatpush.msrb.mxu1 %v808_v44  ;;  %874 = vmatpush.msra.mxu2 %v848_v55 }
  0x7e   : > { %875 = vmatpush.msra.mxu2 %v847_v56 }
  0x80   : > { %876 = vmatpush.msra.mxu2 %v846_v57 }
  0xe4   : > { %v668_v7 = vpop.f32.mrf.mxu0 }
  0xe5   : > { %v669_v8 = vadd.f32 %v1189_v6, %v668_v7 }
  0xe7   : > { %v672_v9 = vmul.f32 0.01, %v669_v8  ;;  %vm671_vm1 = vcmp.ge.f32.partialorder %v669_v8, 0.0 }
  0xe9   : > { %v673_v10 = vsel %vm671_vm1, %v669_v8, %v672_v9 }
  0xea   : > { %1065 = vmatmul.msk.f32.vlgmr.msra.gmra.mxu1 %vm680_vm2, %v673_v10 }
 0x167   : > { %v701_v18 = vpop.f32.mrf.mxu1 }
 0x168   : > { %v702_v19 = vadd.f32 %v1190_v17, %v701_v18 }
 0x16a   : > { %1066 = vmatmul.msk.f32.vlgmr.msra.gmra.mxu3 %vm708_vm3, %v702_v19 }
 0x172   : > { %1067 = vmatmul.msk.f32.vlgmr.msrb.gmra.mxu3 %vm708_vm3, %v641_v20 }
 0x1ed   : > { %v729_v34 = vpop.f32.mrf.mxu3 }
 0x1f5   : > { %v756_v35 = vpop.f32.mrf.mxu3 }
 0x1f6   : > { %v759_v36 = vperm.slane %v756_v35, 0 }
 0x1f8   : > { %v760_v38 = vadd.f32 %v759_v36, %v729_v34 }
 0x1fa   : > { %v765_v39 = vadd.f32 %v1191_v37, %v760_v38 }
 0x1fc   : > { %vm766_vm4 = vcmp.ge.f32.partialorder %v765_v39, 0.0  ;;  %v767_v40 = vmul.f32 0.01, %v765_v39 }
 0x1fe   : > { %v768_v41 = vsel %vm766_vm4, %v765_v39, %v767_v40 }
 0x1ff   : > { %1068 = vmatmul.msk.f32.vlgmr.msrb.gmra.mxu0 %vm781_vm5, %v768_v41 }
 0x27c   : > { %v802_v51 = vpop.f32.mrf.mxu0 }
 0x27d   : > { %v803_v52 = vadd.f32 %v1192_v50, %v802_v51 }
 0x27f   : > { %vm805_vm6 = vcmp.ge.f32.partialorder %v803_v52, 0.0  ;;  %v806_v53 = vmul.f32 0.01, %v803_v52 }
 0x281   : > { %v807_v54 = vsel %vm805_vm6, %v803_v52, %v806_v53 }
 0x282   : > { %1069 = vmatmul.msk.f32.vlgmr.msrb.gmra.mxu1 %vm781_vm5, %v807_v54 }
 0x2ff   : > { %v840_v59 = vpop.f32.mrf.mxu1 }
 0x300   : > { %v841_v60 = vadd.f32 %v1193_v58, %v840_v59 }
 0x302   : > { %v844_v61 = vmul.f32 0.01, %v841_v60  ;;  %vm843_vm7 = vcmp.ge.f32.partialorder %v841_v60, 0.0 }
 0x304   : > { %v845_v62 = vsel %vm843_vm7, %v841_v60, %v844_v61 }
 0x305   : > { %1070 = vmatmul.msk.f32.vlgmr.msra.gmra.mxu2 %vm781_vm5, %v845_v62 }
 0x388   : > { %v878_v0 = vpop.f32.mrf.mxu2 }
 0x389   : > { %v879_v1 = vadd.f32 %v1194_v63, %v878_v0 }
 0x38b   : > { %881 = vst.msk [vmem:[%s639_s29] sm:$0xff] %vm708_vm3, %v879_v1 }
 0x38c   : > { %1462 = shalt.err (!%p1459_p8)
}
 0x38d   : > { %1103 = dma.vmem_to_hbm [thread:$0]  (%p1710_p5), %s896_s14, 128, %s898_s15, %s883_s25  }
 0x38e PF: > { %s909_s7 = sand.u32 1, %s1509_s18   ;;  %p1960_p10 = scmp.ge.s32.totalorder %s1521_s21, 2 }
 0x38f   : > { %s910_s5 = scalar_lea.sflag [#allocation4], %s909_s7 }
 0x390   : > { %p1132_p13 = pnand %p1960_p10, %p1714_p6 }
 0x392   : > { %p1133_p11 = pneg %p1132_p13 }
 0x394   : > { %1504 = dma.done.wait (%p1133_p11), %s910_s5, 128  }
 0x395   : > { %1506 = vsyncadd (%p1133_p11), %s910_s5, 4294967168  ;;  %s1961_s21 = sld [smem:[#allocation25_spill]]  ;;  %s1964_s18 = smov %s1513_s19 }
 0x396   : > { %s1962_s26 = sld [smem:[#allocation24_spill]] }
 0x397   : > { %s1963_s20 = sld [smem:[#allocation26_spill]] }
 0x39b   : > { %p34_p0 = scmp.ge.s32.totalorder %s1961_s21, 4  }
 0x39c   : > { %s1965_s19 = smov %s1962_s26 }
 0x39d   :  { %36 = sbr.rel (!%p34_p0) target bundleno = 21 (0x15), region = 162 }
 0x3a2   :  { %916 = vsyncpa [#allocation3], 1 }
 0x3a3   :  { %918 = vsyncpa [#allocation3 + $0x1], 1 }
 0x3a4   :  { %919 = vsyncpa [#allocation6], 1 }
 0x3a5   :  { %921 = vsyncpa [#allocation6 + $0x1], 1 }
 0x3a6   :  { %922 = vsyncpa [#allocation9], 1 }
 0x3a7   :  { %923 = vsyncpa [#allocation12], 1 }
 0x3a8   :  { %924 = vsyncpa [#allocation15], 1 }
 0x3a9   :  { %925 = vsyncpa [#allocation4], 1 }
 0x3aa   :  { %927 = vsyncpa [#allocation4 + $0x1], 1 }

</bundles_post_ra>
